<compile_context>
chip_gen: v7x
topology: tpu7x:2x2x1
jax: 0.10.0
libtpu: 0.0.40
codegen_flags: <defaults>
</compile_context>

<pallas_src>
import functools

import jax
import jax.numpy as jnp
from jax.experimental import pallas as pl
from jax.experimental.pallas import tpu as pltpu

LANE = 128


def _round_up(x, m):
    return ((x + m - 1) // m) * m


def _pick_tile(n_pad, pref):
    # largest multiple of 128 <= pref that divides n_pad (n_pad is a multiple of 128)
    t = min(pref, n_pad)
    while n_pad % t:
        t -= LANE
    return t


def _pad2(a, rows, cols):
    return jnp.pad(a, ((0, rows - a.shape[0]), (0, cols - a.shape[1])))


# ----------------------------------------------------------------------------
# Kernel 1: one GCN layer  ->  relu( (A @ H) @ W + b ), tiled over (rows, K)
# ----------------------------------------------------------------------------
def gcn_layer_kernel(a_ref, x_ref, w_ref, b_ref, o_ref, acc_ref, *, apply_relu):
    k = pl.program_id(1)

    @pl.when(k == 0)
    def _():
        acc_ref[...] = jnp.zeros_like(acc_ref)

    # bf16 x bf16 -> f32 accumulation on the MXU
    acc_ref[...] += jnp.dot(a_ref[...], x_ref[...],
                            preferred_element_type=jnp.float32)

    @pl.when(k == pl.num_programs(1) - 1)
    def _():
        h = jnp.dot(acc_ref[...], w_ref[...],
                    preferred_element_type=jnp.float32) + b_ref[...]
        if apply_relu:
            h = jnp.maximum(h, 0.0)
        o_ref[...] = h.astype(o_ref.dtype)


def gcn_layer(adj_p, x_p, w_p, b_p, apply_relu, *, tm, tk):
    n_pad = adj_p.shape[0]
    d_in = x_p.shape[1]
    d_out = w_p.shape[1]
    kernel = functools.partial(gcn_layer_kernel, apply_relu=apply_relu)
    return pl.pallas_call(
        kernel,
        out_shape=jax.ShapeDtypeStruct((n_pad, d_out), jnp.bfloat16),
        grid=(n_pad // tm, n_pad // tk),
        in_specs=[
            pl.BlockSpec((tm, tk), lambda i, k: (i, k)),        # A tile stream
            pl.BlockSpec((tk, d_in), lambda i, k: (k, 0)),      # H tile stream
            pl.BlockSpec((d_in, d_out), lambda i, k: (0, 0)),   # W resident
            pl.BlockSpec((1, d_out), lambda i, k: (0, 0)),      # b resident
        ],
        out_specs=pl.BlockSpec((tm, d_out), lambda i, k: (i, 0)),
        scratch_shapes=[pltpu.VMEM((tm, d_out), jnp.float32)],
        compiler_params=pltpu.CompilerParams(
            dimension_semantics=("parallel", "arbitrary")),
    )(adj_p, x_p, w_p, b_p)


def gcn_forward(adj, x, gnn_params, *, tm_pref=512, tk_pref=1024):
    """Pads node/feature dims, streams A in bf16, returns bf16 emb (n_pad, 128)."""
    n = adj.shape[0]
    n_pad = _round_up(n, LANE)
    tm = _pick_tile(n_pad, tm_pref)
    tk = _pick_tile(n_pad, tk_pref)

    # zero-padded adjacency: padded rows/cols contribute nothing
    adj_p = _pad2(adj.astype(jnp.float32), n_pad, n_pad).astype(jnp.bfloat16)
    d_in_pad = _round_up(x.shape[1], LANE)
    h = _pad2(x.astype(jnp.float32), n_pad, d_in_pad).astype(jnp.bfloat16)

    n_layers = len(gnn_params)
    for li, (w, b) in enumerate(gnn_params):
        d_out_pad = _round_up(w.shape[1], LANE)
        w_p = _pad2(w.astype(jnp.float32), h.shape[1], d_out_pad)
        b_p = _pad2(b.astype(jnp.float32), 1, d_out_pad)
        h = gcn_layer(adj_p, h, w_p, b_p,
                      apply_relu=(li < n_layers - 1), tm=tm, tk=tk)
    return h  # rows >= n and cols >= hid_dim are padding


# ----------------------------------------------------------------------------
# Kernel 2: pairwise feature + both heads + both cross-entropy losses,
#           tiled over the sample axis S, scalar losses accumulated in SMEM.
# ----------------------------------------------------------------------------
def pair_loss_kernel(ei_ref, ej_ref, yi_ref, yj_ref, valid_ref,
                     w1d_ref, b1d_ref, w2d_ref, b2d_ref,
                     w1s_ref, b1s_ref, w2s_ref, b2s_ref,
                     loss_ref, acc_ref,
                     *, n_dire, n_dist, total_s):
    step = pl.program_id(0)

    @pl.when(step == 0)
    def _():
        acc_ref[0] = jnp.float32(0.0)
        acc_ref[1] = jnp.float32(0.0)

    ei = ei_ref[...].astype(jnp.float32)
    ej = ej_ref[...].astype(jnp.float32)
    e = ei - ej + ei * ej                       # e_ij = emb_i - emb_j + emb_i*emb_j
    valid = valid_ref[...]                      # (TS, 1) f32, 0.0 on padded samples
    diff = yi_ref[...] - yj_ref[...]            # (TS, 1) int32

    def head_sum(inp, w1, b1, w2, b2, cls, n_cls):
        h = jnp.maximum(
            jnp.dot(inp, w1, preferred_element_type=jnp.float32) + b1, 0.0)
        logits = jnp.dot(h, w2, preferred_element_type=jnp.float32) + b2
        lane = jax.lax.broadcasted_iota(jnp.int32, logits.shape, 1)
        lane_ok = lane < n_cls
        neg = jnp.float32(-1e30)
        logits = jnp.where(lane_ok, logits, neg)
        # nn.Softmax(dim=1) in the head, then F.cross_entropy applies
        # log_softmax again -> replicate the double softmax exactly, masking
        # the padded class lanes out of both normalizations.
        probs = jax.nn.softmax(logits, axis=1)
        probs = jnp.where(lane_ok, probs, neg)
        logp = jax.nn.log_softmax(probs, axis=1)
        onehot = (lane == cls).astype(jnp.float32)
        per_sample = jnp.sum(onehot * logp, axis=1, keepdims=True)   # (TS, 1)
        return -jnp.sum(per_sample * valid)

    # direction head: class 0 if diff<0, 1 if diff==0, 2 otherwise
    dire_cls = jnp.where(diff < 0, 0,
                         jnp.where(diff == 0, 1, 2)).astype(jnp.int32)
    # distance head on |e_ij|, target = |y_i - y_j| (ratings in [0, 3])
    dist_cls = jnp.abs(diff).astype(jnp.int32)

    acc_ref[0] += head_sum(e, w1d_ref[...], b1d_ref[...],
                           w2d_ref[...], b2d_ref[...], dire_cls, n_dire)
    acc_ref[1] += head_sum(jnp.abs(e), w1s_ref[...], b1s_ref[...],
                           w2s_ref[...], b2s_ref[...], dist_cls, n_dist)

    @pl.when(step == pl.num_programs(0) - 1)
    def _():
        inv = jnp.float32(1.0 / total_s)        # divide by the TRUE sample count
        loss_ref[0] = acc_ref[0] * inv
        loss_ref[1] = acc_ref[1] * inv


def pair_losses(emb_i, emb_j, yi, yj, valid, dire_p, dist_p,
                *, n_dire, n_dist, total_s, ts):
    s_pad, h_pad = emb_i.shape
    w1d, b1d, w2d, b2d = dire_p
    w1s, b1s, w2s, b2s = dist_p

    kernel = functools.partial(pair_loss_kernel, n_dire=n_dire,
                               n_dist=n_dist, total_s=total_s)

    stream2 = lambda: pl.BlockSpec((ts, h_pad), lambda s: (s, 0))
    stream1 = lambda: pl.BlockSpec((ts, 1), lambda s: (s, 0))
    resident = lambda a: pl.BlockSpec(a.shape, lambda s: (0, 0))

    return pl.pallas_call(
        kernel,
        out_shape=jax.ShapeDtypeStruct((2,), jnp.float32),
        grid=(s_pad // ts,),
        in_specs=[
            stream2(), stream2(),                  # emb_i, emb_j
            stream1(), stream1(), stream1(),       # yi, yj, valid
            resident(w1d), resident(b1d), resident(w2d), resident(b2d),
            resident(w1s), resident(b1s), resident(w2s), resident(b2s),
        ],
        out_specs=pl.BlockSpec(memory_space=pltpu.MemorySpace.SMEM),
        scratch_shapes=[pltpu.SMEM((2,), jnp.float32)],
        compiler_params=pltpu.CompilerParams(
            dimension_semantics=("arbitrary",)),
    )(emb_i, emb_j, yi, yj, valid,
      w1d, b1d, w2d, b2d, w1s, b1s, w2s, b2s)


# ----------------------------------------------------------------------------
# Glue (plain JAX): adjacency normalization, param init, full forward
# ----------------------------------------------------------------------------
def normalized_adj(src, dst, n):
    a = jnp.zeros((n, n), jnp.float32).at[src, dst].set(1.0)
    a = jnp.maximum(a, a.T)                # symmetrize
    a = a + jnp.eye(n, dtype=jnp.float32)  # self loops
    deg = jnp.sum(a, axis=1)
    d_inv_sqrt = 1.0 / jnp.sqrt(deg)
    return a * d_inv_sqrt[:, None] * d_inv_sqrt[None, :]


def init_linear(key, din, dout):
    k1, k2 = jax.random.split(key)
    bound = 1.0 / (din ** 0.5)
    w = jax.random.uniform(k1, (din, dout), jnp.float32, -bound, bound)
    b = jax.random.uniform(k2, (1, dout), jnp.float32, -bound, bound)
    return w, b


def pretrain_forward(x, y, adj, row, col, params):
    # GNN backbone (GCN), relu on all but last layer
    emb = gcn_forward(adj, x, params["gnn"])   # (n_pad, 128) bf16, zero-padded

    s = int(row.shape[0])
    ts = 256
    s_pad = _round_up(s, ts)
    h_pad = emb.shape[1]

    # pair gather + S-padding (glue; padded samples masked out by `valid`)
    emb_i = _pad2(emb[row], s_pad, h_pad)
    emb_j = _pad2(emb[col], s_pad, h_pad)
    yi = _pad2(y[row].reshape(-1, 1).astype(jnp.int32), s_pad, 1)
    yj = _pad2(y[col].reshape(-1, 1).astype(jnp.int32), s_pad, 1)
    valid = _pad2(jnp.ones((s, 1), jnp.float32), s_pad, 1)

    def pad_head(p):
        w1, b1, w2, b2 = p
        n_cls = w2.shape[1]
        padded = (_pad2(w1.astype(jnp.float32), h_pad, h_pad),
                  _pad2(b1.astype(jnp.float32), 1, h_pad),
                  _pad2(w2.astype(jnp.float32), h_pad, LANE),
                  _pad2(b2.astype(jnp.float32), 1, LANE))
        return padded, n_cls

    dire_p, n_dire = pad_head(params["dire"])
    dist_p, n_dist = pad_head(params["dist"])

    losses = pair_losses(emb_i, emb_j, yi, yj, valid, dire_p, dist_p,
                         n_dire=n_dire, n_dist=n_dist, total_s=s, ts=ts)
    return losses[0], losses[1]


if __name__ == "__main__":
    key = jax.random.PRNGKey(0)
    keys = jax.random.split(key, 12)

    # small shapes consistent with the module's forward
    N = 64            # number of graph nodes (module hardcodes 4548; scaled down)
    E = 256           # number of edges
    INPUT_DIM = 16    # args.input_dim
    HID_DIM = 32      # args.hid_dim
    NUM_LAYER = 2     # args.num_layer
    S = 300           # number of sampled node pairs (module uses 4548; scaled down)

    x = jax.random.normal(keys[0], (N, INPUT_DIM), jnp.float32)
    y = jax.random.randint(keys[1], (N,), 0, 4)          # ratings in {0,1,2,3}
    src = jax.random.randint(keys[2], (E,), 0, N)
    dst = jax.random.randint(keys[3], (E,), 0, N)
    adj = normalized_adj(src, dst, N)

    # deterministic stand-in for the np.random pair sampling in forward()
    row = jax.random.randint(keys[4], (S,), 0, N)
    col = jax.random.randint(keys[5], (S,), 0, N)

    # synthetic, deterministic parameters
    gnn_params = []
    din = INPUT_DIM
    for li in range(NUM_LAYER):
        w, b = init_linear(keys[6 + li], din, HID_DIM)
        gnn_params.append((w, b))
        din = HID_DIM
    w1d, b1d = init_linear(keys[8], HID_DIM, HID_DIM)
    w2d, b2d = init_linear(keys[9], HID_DIM, 3)   # direction head -> 3 classes
    w1s, b1s = init_linear(keys[10], HID_DIM, HID_DIM)
    w2s, b2s = init_linear(keys[11], HID_DIM, 4)  # distance head  -> 4 classes

    params = {
        "gnn": gnn_params,
        "dire": (w1d, b1d, w2d, b2d),
        "dist": (w1s, b1s, w2s, b2s),
    }

    loss_dire, loss_dist = pretrain_forward(x, y, adj, row, col, params)
    jax.block_until_ready((loss_dire, loss_dist))
    assert loss_dire.shape == () and loss_dist.shape == ()
    assert bool(jnp.isfinite(loss_dire)) and bool(jnp.isfinite(loss_dist))
    print("KERNEL_OK")
</pallas_src>

<mosaic_0001>
module attributes {stable_mosaic.version = 11 : i64} {
  func.func @gcn_layer_kernel(%arg0: i32, %arg1: i32, %arg2: memref<128x128xbf16, #tpu.memory_space<vmem>>, %arg3: memref<128x128xbf16, #tpu.memory_space<vmem>>, %arg4: memref<128x128xf32, #tpu.memory_space<vmem>>, %arg5: memref<1x128xf32, #tpu.memory_space<vmem>>, %arg6: memref<128x128xbf16, #tpu.memory_space<vmem>>, %arg7: memref<128x128xf32, #tpu.memory_space<vmem>>) attributes {dimension_semantics = [#tpu.dimension_semantics<parallel>, #tpu.dimension_semantics<arbitrary>], iteration_bounds = array<i64: 1, 1>, scalar_prefetch = 0 : i64, scratch_operands = 1 : i64, tpu.core_type = #tpu.core_type<tc>, window_params = [{transform_indices = @transform_0, window_bounds = array<i64: 128, 128>}, {transform_indices = @transform_1, window_bounds = array<i64: 128, 128>}, {pipeline_mode = #tpu.pipeline_mode<synchronous>, transform_indices = @transform_2, window_bounds = array<i64: 128, 128>}, {pipeline_mode = #tpu.pipeline_mode<synchronous>, transform_indices = @transform_3, window_bounds = array<i64: 1, 128>}, {transform_indices = @transform_4, window_bounds = array<i64: 128, 128>}]} {
    %c0_i32 = arith.constant 0 : i32
    %0 = arith.cmpi eq, %arg1, %c0_i32 : i32
    %1 = arith.extui %0 : i1 to i32
    %c0_i32_0 = arith.constant 0 : i32
    %2 = arith.cmpi ne, %1, %c0_i32_0 : i32
    scf.if %2 {
      %cst_10 = arith.constant 0.000000e+00 : f32
      %12 = vector.broadcast %cst_10 : f32 to vector<128x128xf32>
      %c0_11 = arith.constant 0 : index
      %c0_12 = arith.constant 0 : index
      %13 = vector.load %arg7[%c0_11, %c0_12] : memref<128x128xf32, #tpu.memory_space<vmem>>, vector<128x128xf32>
      tpu.vector_store %arg7[%c0_11, %c0_12], %12 {strides = array<i32>} : memref<128x128xf32, #tpu.memory_space<vmem>>, vector<128x128xf32>,
    } else {
    }
    %c0 = arith.constant 0 : index
    %c0_1 = arith.constant 0 : index
    %3 = vector.load %arg7[%c0, %c0_1] : memref<128x128xf32, #tpu.memory_space<vmem>>, vector<128x128xf32>
    %c0_2 = arith.constant 0 : index
    %c0_3 = arith.constant 0 : index
    %4 = vector.load %arg2[%c0_2, %c0_3] : memref<128x128xbf16, #tpu.memory_space<vmem>>, vector<128x128xbf16>
    %c0_4 = arith.constant 0 : index
    %c0_5 = arith.constant 0 : index
    %5 = vector.load %arg3[%c0_4, %c0_5] : memref<128x128xbf16, #tpu.memory_space<vmem>>, vector<128x128xbf16>
    %cst = arith.constant dense<0.000000e+00> : vector<128x128xf32>
    %6 = tpu.matmul %4, %5, %cst {dimension_numbers = #tpu.dot_dimension_numbers<[1], [0], [0], [1], [0, 0, 1, 1], [], []>} : vector<128x128xbf16>, vector<128x128xbf16>, vector<128x128xf32> -> vector<128x128xf32>
    %7 = arith.addf %3, %6 : vector<128x128xf32>
    %c0_6 = arith.constant 0 : index
    %c0_7 = arith.constant 0 : index
    %8 = vector.load %arg7[%c0_6, %c0_7] : memref<128x128xf32, #tpu.memory_space<vmem>>, vector<128x128xf32>
    tpu.vector_store %arg7[%c0_6, %c0_7], %7 {strides = array<i32>} : memref<128x128xf32, #tpu.memory_space<vmem>>, vector<128x128xf32>,
    %c0_i32_8 = arith.constant 0 : i32
    %9 = arith.cmpi eq, %arg1, %c0_i32_8 : i32
    %10 = arith.extui %9 : i1 to i32
    %c0_i32_9 = arith.constant 0 : i32
    %11 = arith.cmpi ne, %10, %c0_i32_9 : i32
    scf.if %11 {
      %c0_10 = arith.constant 0 : index
      %c0_11 = arith.constant 0 : index
      %12 = vector.load %arg7[%c0_10, %c0_11] : memref<128x128xf32, #tpu.memory_space<vmem>>, vector<128x128xf32>
      %c0_12 = arith.constant 0 : index
      %c0_13 = arith.constant 0 : index
      %13 = vector.load %arg4[%c0_12, %c0_13] : memref<128x128xf32, #tpu.memory_space<vmem>>, vector<128x128xf32>
      %cst_14 = arith.constant dense<0.000000e+00> : vector<128x128xf32>
      %14 = tpu.matmul %12, %13, %cst_14 {dimension_numbers = #tpu.dot_dimension_numbers<[1], [0], [0], [1], [0, 0, 1, 1], [], []>} : vector<128x128xf32>, vector<128x128xf32>, vector<128x128xf32> -> vector<128x128xf32>
      %c0_15 = arith.constant 0 : index
      %c0_16 = arith.constant 0 : index
      %15 = vector.load %arg5[%c0_15, %c0_16] : memref<1x128xf32, #tpu.memory_space<vmem>>, vector<1x128xf32>
      %16 = vector.broadcast %15 : vector<1x128xf32> to vector<128x128xf32>
      %17 = arith.addf %14, %16 : vector<128x128xf32>
      %cst_17 = arith.constant 0.000000e+00 : f32
      %18 = vector.broadcast %cst_17 : f32 to vector<128x128xf32>
      %19 = arith.maximumf %17, %18 : vector<128x128xf32>
      %20 = arith.truncf %19 : vector<128x128xf32> to vector<128x128xbf16>
      %c0_18 = arith.constant 0 : index
      %c0_19 = arith.constant 0 : index
      %21 = vector.load %arg6[%c0_18, %c0_19] : memref<128x128xbf16, #tpu.memory_space<vmem>>, vector<128x128xbf16>
      tpu.vector_store %arg6[%c0_18, %c0_19], %20 {strides = array<i32>} : memref<128x128xbf16, #tpu.memory_space<vmem>>, vector<128x128xbf16>,
    } else {
    }
    return
  }
  func.func @transform_0(%arg0: i32, %arg1: i32) -> (i32, i32) {
    %c0_i32 = arith.constant 0 : i32
    return %arg0, %arg1 : i32, i32
  }
  func.func @transform_1(%arg0: i32, %arg1: i32) -> (i32, i32) {
    %c0_i32 = arith.constant 0 : i32
    %c0_i32_0 = arith.constant 0 : i32
    return %arg1, %c0_i32 : i32, i32
  }
  func.func @transform_2(%arg0: i32, %arg1: i32) -> (i32, i32) {
    %c0_i32 = arith.constant 0 : i32
    %c0_i32_0 = arith.constant 0 : i32
    %c0_i32_1 = arith.constant 0 : i32
    return %c0_i32, %c0_i32_0 : i32, i32
  }
  func.func @transform_3(%arg0: i32, %arg1: i32) -> (i32, i32) {
    %c0_i32 = arith.constant 0 : i32
    %c0_i32_0 = arith.constant 0 : i32
    %c0_i32_1 = arith.constant 0 : i32
    return %c0_i32, %c0_i32_0 : i32, i32
  }
  func.func @transform_4(%arg0: i32, %arg1: i32) -> (i32, i32) {
    %c0_i32 = arith.constant 0 : i32
    %c0_i32_0 = arith.constant 0 : i32
    return %arg0, %c0_i32 : i32, i32
  }
}

</mosaic_0001>

<bundles_post_ra>
// kernel: tpu_custom_call.1
= control target key start
LH: loop header
LB: loop body
LE: loop exit
PB: predicated region body
PF: predicated region fallthrough
CT: control target
= control target key end

     0   :  { %9 = vsyncpa [#allocation4], 0  ;;  %s1136_s0 = inlined_call_operand.hbm [shape: bf16[128,128], index: 0, kind: input, shape index: {}]   ;;  %s1137_s1 = inlined_call_operand.hbm [shape: bf16[128,128], index: 1, kind: input, shape index: {}]   ;;  %s1138_s2 = inlined_call_operand.hbm [shape: f32[128,128], index: 2, kind: input, shape index: {}]   ;;  %s1139_s3 = inlined_call_operand.vmem [shape: f32[1,128], index: 3, kind: input, shape index: {}]   ;;  %s1140_s4 = inlined_call_operand.hbm [shape: bf16[128,128], index: 4, kind: output, shape index: {}]  }
   0x1   :  { %10 = vsyncpa [#allocation7], 0 }
   0x2   :  { %11 = vsyncpa [#allocation5], 0  ;;  %s1036_s15 = smov [#allocation6]   ;;  %s1037_s17 = smov [#allocation3]  }
   0x3   :  { %s29_s16 = sshll.u32 %s1036_s15, 4  ;;  %s17_s18 = sshll.u32 %s1037_s17, 4  ;;  %s30_s16 = int_to_ptr.vmem [resolvable:$true] %s29_s16  ;;  %s1069_s18 = int_to_ptr.vmem [resolvable:$true] %s17_s18 }
   0x4   :  { %s942_s21 = scalar_lea.hbm %s1137_s1, 1024 }
   0x5   :  { %p943_p0 = scmp.ne.s32.totalorder %s1137_s1, %s942_s21  ;;  %p946_p1 = scmp.lt.u32.totalorder %s942_s21, %s1137_s1 }
   0x7   :  { %p948_p2 = pnand %p946_p1, %p943_p0 }
   0x9   :  { %951 = shalt.err (!%p948_p2)
}
   0xa   :  { %s952_s26 = scalar_lea.vmem %s30_s16, 1024  ;;  %p957_p4 = scmp.lt.s32.totalorder %s30_s16, %s30_s16 }
   0xb   :  { %p953_p3 = scmp.ne.s32.totalorder %s30_s16, %s952_s26  ;;  %p958_p5 = scmp.lt.s32.totalorder %s952_s26, %s952_s26 }
   0xd   :  { %p959_p6 = por %p958_p5, %p957_p4 }
   0xf   :  { %p960_p7 = pnand %p959_p6, %p953_p3 }
  0x11   :  { %963 = shalt.err (!%p960_p7)
}
  0x12   :  { %s1038_s27 = smov 64   ;;  %s1039_s28 = smov 4  }
  0x13   :  { %35 = dma.hbm_to_vmem [thread:$0]  %s1137_s1, 1024, %s30_s16, [#allocation7], %s1038_s27, %s1038_s27, %s1039_s28  }
  0x14   :  { %s964_s7 = scalar_lea.hbm %s1136_s0, 1024 }
  0x15   :  { %p965_p8 = scmp.ne.s32.totalorder %s1136_s0, %s964_s7  ;;  %p968_p9 = scmp.lt.u32.totalorder %s964_s7, %s1136_s0 }
  0x17   :  { %p970_p10 = pnand %p968_p9, %p965_p8 }
  0x19   :  { %973 = shalt.err (!%p970_p10)
}
  0x1a   :  { %s974_s12 = scalar_lea.vmem %s1069_s18, 1024  ;;  %p979_p12 = scmp.lt.s32.totalorder %s1069_s18, %s1069_s18 }
  0x1b   :  { %p975_p11 = scmp.ne.s32.totalorder %s1069_s18, %s974_s12  ;;  %p980_p13 = scmp.lt.s32.totalorder %s974_s12, %s974_s12 }
  0x1d   :  { %p981_p0 = por %p980_p13, %p979_p12 }
  0x1f   :  { %p982_p1 = pnand %p981_p0, %p975_p11 }
  0x21   :  { %985 = shalt.err (!%p982_p1)
}
  0x22   :  { %23 = dma.hbm_to_vmem [thread:$0]  %s1136_s0, 1024, %s1069_s18, [#allocation4], %s1038_s27, %s1038_s27, %s1039_s28  }
  0x23   :  { %s1040_s14 = smov [#allocation8]   ;;  %s986_s19 = scalar_lea.hbm %s1138_s2, 2048 }
  0x24   :  { %s41_s15 = sshll.u32 %s1040_s14, 4  ;;  %p987_p2 = scmp.ne.s32.totalorder %s1138_s2, %s986_s19  ;;  %s42_s15 = int_to_ptr.vmem [resolvable:$true] %s41_s15 }
  0x25   :  { %p990_p3 = scmp.lt.u32.totalorder %s986_s19, %s1138_s2 }
  0x27   :  { %p992_p4 = pnand %p990_p3, %p987_p2 }
  0x29   :  { %995 = shalt.err (!%p992_p4)
}
  0x2a   :  { %s996_s24 = scalar_lea.vmem %s42_s15, 2048  ;;  %p1001_p6 = scmp.lt.s32.totalorder %s42_s15, %s42_s15 }
  0x2b   :  { %p997_p5 = scmp.ne.s32.totalorder %s42_s15, %s996_s24  ;;  %p1002_p7 = scmp.lt.s32.totalorder %s996_s24, %s996_s24 }
  0x2d   :  { %p1003_p8 = por %p1002_p7, %p1001_p6 }
  0x2f   :  { %p1004_p9 = pnand %p1003_p8, %p997_p5 }
  0x31   :  { %1007 = shalt.err (!%p1004_p9)
}
  0x32   :  { %s1041_s0 = smov 128   ;;  %s1042_s18 = smov 8  }
  0x33   :  { %47 = dma.hbm_to_vmem [thread:$0]  %s1138_s2, 2048, %s42_s15, [#allocation7], %s1041_s0, %s1041_s0, %s1042_s18  }
  0x34   :  { %1030 = dma.done.wait [#allocation4], 1024  }
  0x35   :  { %1031 = vsyncadd [#allocation4], 4294966272 }
  0x36   :  { %1032 = dma.done.wait [#allocation7], 3072  }
  0x37   :  { %1033 = vsyncadd [#allocation7], 4294964224  ;;  %v926_v0 = vld [vmem:[#allocation6] sm:$0xff]   ;;  %v927_v1 = vld [vmem:[#allocation6 + $0x8] sm:$0xff]  }
  0x38   :  { %798 = vmatprep.subr.bf16.mxu0 %v926_v0  ;;  %v928_v2 = vld [vmem:[#allocation6 + $0x10] sm:$0xff]   ;;  %v929_v3 = vld [vmem:[#allocation6 + $0x18] sm:$0xff]   ;;  %v934_v4 = vld [vmem:[#allocation3] sm:$0xff]  }
  0x39   :  { %799 = vmatpush3.bf16.msra.mxu0 %v926_v0  ;;  %814 = vmatprep.mubr.bf16.mxu0 %v934_v4  ;;  %v930_v5 = vld [vmem:[#allocation6 + $0x20] sm:$0xff]   ;;  %v931_v6 = vld [vmem:[#allocation6 + $0x28] sm:$0xff]   ;;  %v374_v9 = vld [vmem:[#allocation8 + $0x10] sm:$0xff] }
  0x3a   :  { %800 = vmatprep.subr.bf16.mxu0 %v927_v1  ;;  %v372_v7 = vld [vmem:[#allocation8] sm:$0xff]  ;;  %v373_v8 = vld [vmem:[#allocation8 + $0x8] sm:$0xff]  ;;  %v375_v11 = vld [vmem:[#allocation8 + $0x18] sm:$0xff] }
  0x3b   :  { %v886_v10 = vpack.c.bf16 %v373_v8, %v372_v7  ;;  %v890_v12 = vpack.c.bf16 %v375_v11, %v374_v9  ;;  %v376_v13 = vld [vmem:[#allocation8 + $0x20] sm:$0xff]  ;;  %v377_v14 = vld [vmem:[#allocation8 + $0x28] sm:$0xff]  ;;  %v932_v15 = vld [vmem:[#allocation6 + $0x30] sm:$0xff]  }
  0x3c   :  { %v894_v16 = vpack.c.bf16 %v377_v14, %v376_v13  ;;  %v378_v17 = vld [vmem:[#allocation8 + $0x30] sm:$0xff]  ;;  %v379_v18 = vld [vmem:[#allocation8 + $0x38] sm:$0xff]  ;;  %v380_v21 = vld [vmem:[#allocation8 + $0x40] sm:$0xff] }
  0x3d   :  { %801 = vmatpush3.bf16.msra.mxu0 %v927_v1  ;;  %887 = vmatprep.subr.bf16.mxu1 %v886_v10  ;;  %v933_v19 = vld [vmem:[#allocation6 + $0x38] sm:$0xff]   ;;  %v898_v20 = vpack.c.bf16 %v379_v18, %v378_v17  ;;  %v381_v22 = vld [vmem:[#allocation8 + $0x48] sm:$0xff]  ;;  %v382_v25 = vld [vmem:[#allocation8 + $0x50] sm:$0xff] }
  0x3e   :  { %802 = vmatprep.subr.bf16.mxu0 %v928_v2  ;;  %889 = vmatpush3.bf16.msra.mxu1 %v886_v10  ;;  %v902_v23 = vpack.c.bf16 %v381_v22, %v380_v21  ;;  %v935_v24 = vld [vmem:[#allocation3 + $0x8] sm:$0xff]   ;;  %v383_v26 = vld [vmem:[#allocation8 + $0x58] sm:$0xff]  ;;  %v936_v27 = vld [vmem:[#allocation3 + $0x10] sm:$0xff]  }
  0x3f   :  { %891 = vmatprep.subr.bf16.mxu1 %v890_v12  ;;  %v906_v28 = vpack.c.bf16 %v383_v26, %v382_v25  ;;  %v384_v29 = vld [vmem:[#allocation8 + $0x60] sm:$0xff]  ;;  %v385_v30 = vld [vmem:[#allocation8 + $0x68] sm:$0xff]  ;;  %v937_v32 = vld [vmem:[#allocation3 + $0x18] sm:$0xff]  }
  0x40   :  { %v910_v31 = vpack.c.bf16 %v385_v30, %v384_v29  ;;  %v938_v33 = vld [vmem:[#allocation3 + $0x20] sm:$0xff]   ;;  %v939_v34 = vld [vmem:[#allocation3 + $0x28] sm:$0xff]   ;;  %v940_v35 = vld [vmem:[#allocation3 + $0x30] sm:$0xff]  }
  0x41   :  { %803 = vmatpush3.bf16.msra.mxu0 %v928_v2  ;;  %v941_v36 = vld [vmem:[#allocation3 + $0x38] sm:$0xff]   ;;  %v386_v37 = vld [vmem:[#allocation8 + $0x70] sm:$0xff]  ;;  %v670_v56 = vld [vmem:[%s1139_s3] ss:$0 sm:$0xff]  ;;  %s1043_s3 = smov [#allocation9]  }
  0x42   :  { %804 = vmatprep.subr.bf16.mxu0 %v929_v3  ;;  %893 = vmatpush3.bf16.msra.mxu1 %v890_v12  ;;  %v387_v38 = vld [vmem:[#allocation8 + $0x78] sm:$0xff]  ;;  %s641_s30 = sshll.u32 %s1043_s3, 4  ;;  %s642_s30 = int_to_ptr.vmem [resolvable:$true] %s641_s30 }
  0x43   :  { %895 = vmatprep.subr.bf16.mxu1 %v894_v16  ;;  %v914_v39 = vpack.c.bf16 %v387_v38, %v386_v37  ;;  %s1008_s5 = scalar_lea.vmem %s642_s30, 1024  ;;  %p1013_p11 = scmp.lt.s32.totalorder %s642_s30, %s642_s30 }
  0x44   :  { %p1009_p10 = scmp.ne.s32.totalorder %s642_s30, %s1008_s5  ;;  %p1014_p12 = scmp.lt.s32.totalorder %s1008_s5, %s1008_s5 }
  0x45   :  { %805 = vmatpush3.bf16.msra.mxu0 %v929_v3 }
  0x46   :  { %806 = vmatprep.subr.bf16.mxu0 %v930_v5  ;;  %897 = vmatpush3.bf16.msra.mxu1 %v894_v16  ;;  %p1015_p13 = por %p1014_p12, %p1013_p11 }
  0x47   :  { %899 = vmatprep.subr.bf16.mxu1 %v898_v20 }
  0x48   :  { %p1016_p0 = pnand %p1015_p13, %p1009_p10 }
  0x49   :  { %807 = vmatpush3.bf16.msra.mxu0 %v930_v5 }
  0x4a   :  { %808 = vmatprep.subr.bf16.mxu0 %v931_v6  ;;  %901 = vmatpush3.bf16.msra.mxu1 %v898_v20 }
  0x4b   :  { %903 = vmatprep.subr.bf16.mxu1 %v902_v23 }
  0x4d   :  { %809 = vmatpush3.bf16.msra.mxu0 %v931_v6 }
  0x4e   :  { %810 = vmatprep.subr.bf16.mxu0 %v932_v15  ;;  %905 = vmatpush3.bf16.msra.mxu1 %v902_v23 }
  0x4f   :  { %907 = vmatprep.subr.bf16.mxu1 %v906_v28 }
  0x51   :  { %811 = vmatpush3.bf16.msra.mxu0 %v932_v15 }
  0x52   :  { %812 = vmatprep.subr.bf16.mxu0 %v933_v19  ;;  %909 = vmatpush3.bf16.msra.mxu1 %v906_v28 }
  0x53   :  { %911 = vmatprep.subr.bf16.mxu1 %v910_v31 }
  0x55   :  { %813 = vmatpush3.bf16.msra.mxu0 %v933_v19 }
  0x56   :  { %913 = vmatpush3.bf16.msra.mxu1 %v910_v31 }
  0x57   :  { %915 = vmatprep.subr.bf16.mxu1 %v914_v39 }
  0x58   :  { %815 = vmatmul.mubr.bf16.vlgmr.msra.gmra.mrb[0].mxu0 %v935_v24 }
  0x59   :  { %818 = vmatprep.mubr.bf16.mxu0 %v936_v27 }
  0x5a   :  { %917 = vmatpush3.bf16.msra.mxu1 %v914_v39 }
  0x60   :  { %819 = vmatmul.mubr.bf16.gmra.mrb[4].mxu0 %v937_v32 }
  0x61   :  { %822 = vmatprep.mubr.bf16.mxu0 %v938_v33 }
  0x68   :  { %823 = vmatmul.mubr.bf16.gmra.mrb[8].mxu0 %v939_v34 }
  0x69   :  { %826 = vmatprep.mubr.bf16.mxu0 %v940_v35 }
  0x70   :  { %827 = vmatmul.mubr.bf16.gmra.mrb[12].mxu0 %v941_v36 }
 0x12b   :  { %v816_v40 = vpop.f32.mrb[0].mxu0 }
 0x12c   :  { %v258_v41 = vpop.f32.mrb[1].mxu0 }
 0x12d   :  { %v817_v42 = vpop.f32.mrb[2].mxu0  ;;  %862 = vmatprep.mubr.f32.mxu1 %v258_v41 }
 0x12e   :  { %v261_v43 = vpop.f32.mrb[3].mxu0 }
 0x12f   :  { %863 = vmatmul.mubr.f32.vlgmr.msra.gmra.mrb[0].mxu1 %v261_v43 }
 0x130   :  { %865 = vmatprep.mubr.f32.mxu1 %v816_v40 }
 0x133   :  { %v820_v44 = vpop.f32.mrb[4].mxu0  ;;  %866 = vmatmul.mubr.f32.gmra.mrb[2].mxu1 %v817_v42 }
 0x134   :  { %v274_v45 = vpop.f32.mrb[5].mxu0 }
 0x135   :  { %v821_v46 = vpop.f32.mrb[6].mxu0  ;;  %868 = vmatprep.mubr.f32.mxu1 %v274_v45 }
 0x136   :  { %v277_v47 = vpop.f32.mrb[7].mxu0 }
 0x137   :  { %869 = vmatmul.mubr.f32.gmra.mrb[4].mxu1 %v277_v47 }
 0x138   :  { %871 = vmatprep.mubr.f32.mxu1 %v820_v44 }
 0x13b   :  { %v824_v48 = vpop.f32.mrb[8].mxu0  ;;  %872 = vmatmul.mubr.f32.gmra.mrb[6].mxu1 %v821_v46 }
 0x13c   :  { %v290_v49 = vpop.f32.mrb[9].mxu0 }
 0x13d   :  { %v825_v50 = vpop.f32.mrb[10].mxu0  ;;  %874 = vmatprep.mubr.f32.mxu1 %v290_v49 }
 0x13e   :  { %v293_v51 = vpop.f32.mrb[11].mxu0 }
 0x13f   :  { %875 = vmatmul.mubr.f32.gmra.mrb[8].mxu1 %v293_v51 }
 0x140   :  { %877 = vmatprep.mubr.f32.mxu1 %v824_v48 }
 0x143   :  { %v828_v52 = vpop.f32.mrb[12].mxu0  ;;  %878 = vmatmul.mubr.f32.gmra.mrb[10].mxu1 %v825_v50 }
 0x144   :  { %v306_v53 = vpop.f32.mrb[13].mxu0 }
 0x145   :  { %v829_v54 = vpop.f32.mrb[14].mxu0  ;;  %880 = vmatprep.mubr.f32.mxu1 %v306_v53 }
 0x146   :  { %v309_v55 = vpop.f32.mrb[15].mxu0 }
 0x147   :  { %881 = vmatmul.mubr.f32.gmra.mrb[12].mxu1 %v309_v55 }
 0x148   :  { %883 = vmatprep.mubr.f32.mxu1 %v828_v52 }
 0x14b   :  { %884 = vmatmul.mubr.f32.gmra.mrb[14].mxu1 %v829_v54 }
 0x202   :  { %v864_v57 = vpop.f32.mrb[0].mxu1 }
 0x203   :  { %v467_v58 = vadd.f32 %v864_v57, %v670_v56  ;;  %v461_v59 = vpop.f32.mrb[1].mxu1 }
 0x204   :  { %v462_v60 = vadd.f32 %v670_v56, %v461_v59 }
 0x205   :  { %v541_v61 = vmax.f32 %v467_v58, 0.0 }
 0x206   :  { %v540_v62 = vmax.f32 %v462_v60, 0.0  ;;  %v867_v63 = vpop.f32.mrb[2].mxu1 }
 0x207   :  { %v477_v0 = vadd.f32 %v867_v63, %v670_v56  ;;  %v471_v1 = vpop.f32.mrb[3].mxu1 }
 0x208   :  { %v706_v2 = vpack.c.bf16 %v541_v61, %v540_v62  ;;  %v472_v3 = vadd.f32 %v670_v56, %v471_v1 }
 0x209   :  { %v543_v4 = vmax.f32 %v477_v0, 0.0 }
 0x20a   :  { %707 = vst [vmem:[#allocation9] sm:$0xff] %v706_v2   ;;  %v542_v5 = vmax.f32 %v472_v3, 0.0  ;;  %v870_v6 = vpop.f32.mrb[4].mxu1 }
 0x20b   :  { %v487_v7 = vadd.f32 %v870_v6, %v670_v56  ;;  %v481_v8 = vpop.f32.mrb[5].mxu1 }
 0x20c   :  { %v711_v9 = vpack.c.bf16 %v543_v4, %v542_v5  ;;  %v482_v10 = vadd.f32 %v670_v56, %v481_v8 }
 0x20d   :  { %v545_v11 = vmax.f32 %v487_v7, 0.0 }
 0x20e   :  { %743 = vst [vmem:[#allocation9 + $0x8] sm:$0xff] %v711_v9   ;;  %v544_v12 = vmax.f32 %v482_v10, 0.0  ;;  %v873_v13 = vpop.f32.mrb[6].mxu1 }
 0x20f   :  { %v497_v14 = vadd.f32 %v873_v13, %v670_v56  ;;  %v491_v15 = vpop.f32.mrb[7].mxu1 }
 0x210   :  { %v716_v16 = vpack.c.bf16 %v545_v11, %v544_v12  ;;  %v492_v17 = vadd.f32 %v670_v56, %v491_v15 }
 0x211   :  { %v547_v18 = vmax.f32 %v497_v14, 0.0 }
 0x212   :  { %744 = vst [vmem:[#allocation9 + $0x10] sm:$0xff] %v716_v16   ;;  %v546_v19 = vmax.f32 %v492_v17, 0.0  ;;  %v876_v20 = vpop.f32.mrb[8].mxu1 }
 0x213   :  { %v507_v21 = vadd.f32 %v876_v20, %v670_v56  ;;  %v501_v22 = vpop.f32.mrb[9].mxu1 }
 0x214   :  { %v721_v23 = vpack.c.bf16 %v547_v18, %v546_v19  ;;  %v502_v24 = vadd.f32 %v670_v56, %v501_v22 }
 0x215   :  { %v549_v25 = vmax.f32 %v507_v21, 0.0 }
 0x216   :  { %745 = vst [vmem:[#allocation9 + $0x18] sm:$0xff] %v721_v23   ;;  %v548_v26 = vmax.f32 %v502_v24, 0.0  ;;  %v879_v27 = vpop.f32.mrb[10].mxu1 }
 0x217   :  { %v517_v28 = vadd.f32 %v879_v27, %v670_v56  ;;  %v511_v29 = vpop.f32.mrb[11].mxu1 }
 0x218   :  { %v726_v30 = vpack.c.bf16 %v549_v25, %v548_v26  ;;  %v512_v31 = vadd.f32 %v670_v56, %v511_v29 }
 0x219   :  { %v551_v32 = vmax.f32 %v517_v28, 0.0 }
 0x21a   :  { %746 = vst [vmem:[#allocation9 + $0x20] sm:$0xff] %v726_v30   ;;  %v550_v33 = vmax.f32 %v512_v31, 0.0  ;;  %v882_v34 = vpop.f32.mrb[12].mxu1 }
 0x21b   :  { %v527_v35 = vadd.f32 %v882_v34, %v670_v56  ;;  %v521_v36 = vpop.f32.mrb[13].mxu1 }
 0x21c   :  { %v731_v37 = vpack.c.bf16 %v551_v32, %v550_v33  ;;  %v522_v38 = vadd.f32 %v670_v56, %v521_v36 }
 0x21d   :  { %v553_v39 = vmax.f32 %v527_v35, 0.0 }
 0x21e   :  { %747 = vst [vmem:[#allocation9 + $0x28] sm:$0xff] %v731_v37   ;;  %v552_v40 = vmax.f32 %v522_v38, 0.0  ;;  %v885_v41 = vpop.f32.mrb[14].mxu1 }
 0x21f   :  { %v537_v42 = vadd.f32 %v885_v41, %v670_v56  ;;  %v531_v43 = vpop.f32.mrb[15].mxu1 }
 0x220   :  { %v736_v44 = vpack.c.bf16 %v553_v39, %v552_v40  ;;  %v532_v45 = vadd.f32 %v670_v56, %v531_v43 }
 0x221   :  { %v555_v46 = vmax.f32 %v537_v42, 0.0 }
 0x222   :  { %748 = vst [vmem:[#allocation9 + $0x30] sm:$0xff] %v736_v44   ;;  %v554_v47 = vmax.f32 %v532_v45, 0.0 }
 0x224   :  { %v741_v48 = vpack.c.bf16 %v555_v46, %v554_v47 }
 0x226   :  { %749 = vst [vmem:[#allocation9 + $0x38] sm:$0xff] %v741_v48  }
 0x227   :  { %1019 = shalt.err (!%p1016_p0)
}
 0x228   :  { %s1020_s8 = scalar_lea.hbm %s1140_s4, 1024 }
 0x229   :  { %p1021_p1 = scmp.ne.s32.totalorder %s1140_s4, %s1020_s8  ;;  %p1024_p2 = scmp.lt.u32.totalorder %s1020_s8, %s1140_s4 }
 0x22b   :  { %p1026_p3 = pnand %p1024_p2, %p1021_p1 }
 0x22d   :  { %1029 = shalt.err (!%p1026_p3)
}
 0x22e   :  { %647 = dma.vmem_to_hbm [thread:$0]  %s642_s30, 1024, %s1140_s4, [#allocation5], %s1038_s27, %s1038_s27, %s1039_s28  }
 0x22f   :  { %1034 = dma.done.wait [#allocation5], 1024  }
 0x230   :  { %1035 = vsyncadd [#allocation5], 4294966272 }
 0x231   :  { %651 = vsyncpa [#allocation4], 1 }
 0x232   :  { %652 = vsyncpa [#allocation7], 1 }
 0x233   :  { %653 = vsyncpa [#allocation5], 1 }

</bundles_post_ra>
